<compile_context>
chip_gen: v5e
topology: v5e:2x2
jax: 0.10.0
libtpu: 0.0.40
codegen_flags: <defaults>
</compile_context>

<pallas_src>
import functools

import jax
import jax.numpy as jnp
from jax import lax
from jax.experimental import pallas as pl
from jax.experimental.pallas import tpu as pltpu


def _nll_kernel(score_ref, target_ref, sum_ref, cnt_ref, *,
                ignore_label, num_classes, rows_total, tile_rows,
                tiles_per_split, ragged_rows):
    p = pl.program_id(1)
    j = pl.program_id(2)

    # Resident per-(n, p) accumulators; zero on the first row-tile.
    @pl.when(j == 0)
    def _():
        sum_ref[...] = jnp.zeros_like(sum_ref)
        cnt_ref[...] = jnp.zeros_like(cnt_ref)

    t = target_ref[...]                                  # (tile_rows, 128) i32

    # Chained class select in the input dtype (exact: at most one class
    # matches each pixel).  One dense (tile_rows, 128) load per class, no
    # iota/one-hot, no XLU reduce; cast only the selected slab to f32.
    sel = jnp.zeros(t.shape, score_ref.dtype)
    for c in range(num_classes):
        sel = jnp.where(t == c, score_ref[c], sel)
    sel = sel.astype(jnp.float32)

    # Valid = not ignored and target in range.  Out-of-range non-ignore
    # targets would otherwise give -log(0) = inf (PyTorch raises; we drop).
    valid = jnp.logical_and(t != ignore_label,
                            jnp.logical_and(t >= 0, t < num_classes))

    def accumulate(valid_mask):
        # Select-then-log: invalid lanes see log(1) = 0, never -inf / NaN.
        loss = -jnp.log(jnp.where(valid_mask, sel, 1.0))
        sum_ref[...] += loss
        cnt_ref[...] += (loss != 0.0).astype(jnp.float32)

    if not ragged_rows:
        accumulate(valid)
    else:
        # Only the globally-last row tile holds rows past the true extent.
        last = jnp.logical_and(p == pl.num_programs(1) - 1,
                               j == pl.num_programs(2) - 1)

        @pl.when(jnp.logical_not(last))
        def _():
            accumulate(valid)

        @pl.when(last)
        def _():
            row = lax.broadcasted_iota(jnp.int32, t.shape, 0)
            base = (p * tiles_per_split + j) * tile_rows
            accumulate(jnp.logical_and(valid, base + row < rows_total))


def nll_loss_std(score_nchw, target_nhw, *, ignore_label=255, loss_weight=1.0,
                 vmem_budget_bytes=16 * 1024 * 1024, pixel_splits=None):
    """NLLLoss.forward with sample='std', class_weight=None."""
    N, C, H, W = score_nchw.shape
    assert target_nhw.shape == (N, H, W)
    HW = H * W
    LANES = 128

    # Free, contiguous reshapes (no transpose).
    score = score_nchw.reshape(N, C, HW)
    target = target_nhw.reshape(N, HW).astype(jnp.int32)

    # Lane-dense layout: pixels -> (rows, 128).  Pad only if HW % 128 != 0
    # (one-off copy; padded pixels carry ignore_label and never contribute).
    pad = (-HW) % LANES
    if pad:
        score = jnp.pad(score, ((0, 0), (0, 0), (0, pad)), constant_values=1.0)
        target = jnp.pad(target, ((0, 0), (0, pad)),
                         constant_values=ignore_label)
    R = (HW + pad) // LANES
    score = score.reshape(N, C, R, LANES)
    target = target.reshape(N, R, LANES)

    # --- tile sizing from a VMEM budget -------------------------------------
    sb = jnp.dtype(score.dtype).itemsize
    # Bytes per row of 128 pixels per pipeline step: score + target double
    # buffers plus the resident sum/count blocks (counted x2 for safety).
    bytes_per_row = LANES * (2 * C * sb + 2 * 4 + 2 * 4 + 2 * 4)
    tile_rows = int(vmem_budget_bytes) // bytes_per_row
    if tile_rows >= R:
        tile_rows = R                               # full extent (always legal)
    else:
        tile_rows = max(8, (tile_rows // 8) * 8)    # keep sublane multiple

    num_row_tiles = -(-R // tile_rows)
    ragged_rows = (R % tile_rows) != 0

    # Optional pixel-axis split so both TensorCores (v7x) get work when the
    # batch alone cannot fill them; harmless on single-TC chips.
    if pixel_splits is None:
        pixel_splits = 2 if (N == 1 and num_row_tiles >= 2
                             and num_row_tiles % 2 == 0) else 1
    if pixel_splits < 1 or num_row_tiles % pixel_splits != 0:
        pixel_splits = 1
    P = pixel_splits
    tiles_per_split = num_row_tiles // P

    kernel = functools.partial(
        _nll_kernel, ignore_label=ignore_label, num_classes=C, rows_total=R,
        tile_rows=tile_rows, tiles_per_split=tiles_per_split,
        ragged_rows=ragged_rows)

    part_sum, part_cnt = pl.pallas_call(
        kernel,
        out_shape=(
            jax.ShapeDtypeStruct((N * P, tile_rows, LANES), jnp.float32),
            jax.ShapeDtypeStruct((N * P, tile_rows, LANES), jnp.float32),
        ),
        grid_spec=pltpu.PrefetchScalarGridSpec(
            num_scalar_prefetch=0,
            grid=(N, P, tiles_per_split),
            in_specs=[
                pl.BlockSpec((None, C, tile_rows, LANES),
                             lambda n, p, j: (n, 0, p * tiles_per_split + j, 0)),
                pl.BlockSpec((None, tile_rows, LANES),
                             lambda n, p, j: (n, p * tiles_per_split + j, 0)),
            ],
            out_specs=[
                pl.BlockSpec((None, tile_rows, LANES),
                             lambda n, p, j: (n * P + p, 0, 0)),
                pl.BlockSpec((None, tile_rows, LANES),
                             lambda n, p, j: (n * P + p, 0, 0)),
            ],
        ),
        compiler_params=pltpu.CompilerParams(
            dimension_semantics=("parallel", "parallel", "arbitrary"),
            vmem_limit_bytes=max(32 << 20, int(vmem_budget_bytes) + (8 << 20)),
        ),
    )(score, target)

    total = jnp.sum(part_sum)
    count = jnp.sum(part_cnt)
    # NaN if no valid (nonzero-loss) pixels, matching torch mean of empty.
    return loss_weight * (total / count)


def _reference(score_nchw, target_nhw, *, ignore_label=255, loss_weight=1.0):
    log_s = jnp.log(score_nchw.astype(jnp.float32))
    t = target_nhw.astype(jnp.int32)
    t_safe = jnp.where(t == ignore_label, 0, t)
    gathered = jnp.take_along_axis(log_s, t_safe[:, None, :, :], axis=1)[:, 0]
    losses = jnp.where(t == ignore_label, 0.0, -gathered)
    flat = losses.reshape(-1)
    mask = flat != 0.0
    return loss_weight * (jnp.sum(jnp.where(mask, flat, 0.0)) / jnp.sum(mask))


if __name__ == "__main__":
    key = jax.random.PRNGKey(0)
    k1, k2, k3 = jax.random.split(key, 3)

    N, C, H, W = 2, 4, 16, 16
    # scores in (0, 1) like probabilities (module takes log of the raw score)
    score = jax.random.uniform(k1, (N, C, H, W), jnp.float32,
                               minval=0.05, maxval=1.0)
    target = jax.random.randint(k2, (N, H, W), 0, C, jnp.int32)
    # sprinkle some ignored pixels
    ignore_mask = jax.random.uniform(k3, (N, H, W)) < 0.1
    target = jnp.where(ignore_mask, 255, target)

    out = nll_loss_std(score, target, ignore_label=255, loss_weight=1.0)
    out = jax.block_until_ready(out)

    ref = _reference(score, target, ignore_label=255, loss_weight=1.0)
    assert jnp.allclose(out, ref, rtol=1e-5, atol=1e-5), (out, ref)

    print("KERNEL_OK")
</pallas_src>

<mosaic_0001>
module attributes {stable_mosaic.version = 11 : i64} {
  func.func @_nll_kernel(%arg0: i32, %arg1: i32, %arg2: i32, %arg3: memref<1x4x2x128xf32, #tpu.memory_space<vmem>>, %arg4: memref<1x2x128xi32, #tpu.memory_space<vmem>>, %arg5: memref<1x2x128xf32, #tpu.memory_space<vmem>>, %arg6: memref<1x2x128xf32, #tpu.memory_space<vmem>>) attributes {dimension_semantics = [#tpu.dimension_semantics<parallel>, #tpu.dimension_semantics<parallel>, #tpu.dimension_semantics<arbitrary>], iteration_bounds = array<i64: 2, 1, 1>, scalar_prefetch = 0 : i64, scratch_operands = 0 : i64, tpu.core_type = #tpu.core_type<tc>, window_params = [{transform_indices = @transform_0, window_bounds = array<i64: 1, 4, 2, 128>}, {transform_indices = @transform_1, window_bounds = array<i64: 1, 2, 128>}, {transform_indices = @transform_2, window_bounds = array<i64: 1, 2, 128>}, {transform_indices = @transform_3, window_bounds = array<i64: 1, 2, 128>}]} {
    %c0_i32 = arith.constant 0 : i32
    %0 = arith.cmpi eq, %arg2, %c0_i32 : i32
    %1 = arith.extui %0 : i1 to i32
    %c0_i32_0 = arith.constant 0 : i32
    %2 = arith.cmpi ne, %1, %c0_i32_0 : i32
    scf.if %2 {
      %cst_33 = arith.constant 0.000000e+00 : f32
      %55 = vector.broadcast %cst_33 : f32 to vector<2x128xf32>
      %c0_34 = arith.constant 0 : index
      %c0_35 = arith.constant 0 : index
      %c0_36 = arith.constant 0 : index
      %56 = vector.load %arg5[%c0_34, %c0_35, %c0_36] : memref<1x2x128xf32, #tpu.memory_space<vmem>>, vector<1x2x128xf32>
      %57 = vector.shape_cast %56 : vector<1x2x128xf32> to vector<2x128xf32>
      %58 = vector.shape_cast %55 : vector<2x128xf32> to vector<1x2x128xf32>
      tpu.vector_store %arg5[%c0_34, %c0_35, %c0_36], %58 {strides = array<i32>} : memref<1x2x128xf32, #tpu.memory_space<vmem>>, vector<1x2x128xf32>,
      %cst_37 = arith.constant 0.000000e+00 : f32
      %59 = vector.broadcast %cst_37 : f32 to vector<2x128xf32>
      %c0_38 = arith.constant 0 : index
      %c0_39 = arith.constant 0 : index
      %c0_40 = arith.constant 0 : index
      %60 = vector.load %arg6[%c0_38, %c0_39, %c0_40] : memref<1x2x128xf32, #tpu.memory_space<vmem>>, vector<1x2x128xf32>
      %61 = vector.shape_cast %60 : vector<1x2x128xf32> to vector<2x128xf32>
      %62 = vector.shape_cast %59 : vector<2x128xf32> to vector<1x2x128xf32>
      tpu.vector_store %arg6[%c0_38, %c0_39, %c0_40], %62 {strides = array<i32>} : memref<1x2x128xf32, #tpu.memory_space<vmem>>, vector<1x2x128xf32>,
    } else {
    }
    %c0 = arith.constant 0 : index
    %c0_1 = arith.constant 0 : index
    %c0_2 = arith.constant 0 : index
    %3 = vector.load %arg4[%c0, %c0_1, %c0_2] : memref<1x2x128xi32, #tpu.memory_space<vmem>>, vector<1x2x128xi32>
    %4 = vector.shape_cast %3 : vector<1x2x128xi32> to vector<2x128xi32>
    %cst = arith.constant 0.000000e+00 : f32
    %5 = vector.broadcast %cst : f32 to vector<2x128xf32>
    %c0_i32_3 = arith.constant 0 : i32
    %6 = vector.broadcast %c0_i32_3 : i32 to vector<2x128xi32>
    %7 = arith.cmpi eq, %4, %6 : vector<2x128xi32>
    %c0_4 = arith.constant 0 : index
    %c0_5 = arith.constant 0 : index
    %c0_6 = arith.constant 0 : index
    %c0_7 = arith.constant 0 : index
    %8 = vector.load %arg3[%c0_4, %c0_5, %c0_6, %c0_7] : memref<1x4x2x128xf32, #tpu.memory_space<vmem>>, vector<1x1x2x128xf32>
    %9 = vector.shape_cast %8 : vector<1x1x2x128xf32> to vector<2x128xf32>
    %10 = arith.select %7, %9, %5 : vector<2x128xi1>, vector<2x128xf32>
    %c1_i32 = arith.constant 1 : i32
    %11 = vector.broadcast %c1_i32 : i32 to vector<2x128xi32>
    %12 = arith.cmpi eq, %4, %11 : vector<2x128xi32>
    %c0_8 = arith.constant 0 : index
    %c1 = arith.constant 1 : index
    %c0_9 = arith.constant 0 : index
    %c0_10 = arith.constant 0 : index
    %13 = vector.load %arg3[%c0_8, %c1, %c0_9, %c0_10] : memref<1x4x2x128xf32, #tpu.memory_space<vmem>>, vector<1x1x2x128xf32>
    %14 = vector.shape_cast %13 : vector<1x1x2x128xf32> to vector<2x128xf32>
    %15 = arith.select %12, %14, %10 : vector<2x128xi1>, vector<2x128xf32>
    %c2_i32 = arith.constant 2 : i32
    %16 = vector.broadcast %c2_i32 : i32 to vector<2x128xi32>
    %17 = arith.cmpi eq, %4, %16 : vector<2x128xi32>
    %c0_11 = arith.constant 0 : index
    %c2 = arith.constant 2 : index
    %c0_12 = arith.constant 0 : index
    %c0_13 = arith.constant 0 : index
    %18 = vector.load %arg3[%c0_11, %c2, %c0_12, %c0_13] : memref<1x4x2x128xf32, #tpu.memory_space<vmem>>, vector<1x1x2x128xf32>
    %19 = vector.shape_cast %18 : vector<1x1x2x128xf32> to vector<2x128xf32>
    %20 = arith.select %17, %19, %15 : vector<2x128xi1>, vector<2x128xf32>
    %c3_i32 = arith.constant 3 : i32
    %21 = vector.broadcast %c3_i32 : i32 to vector<2x128xi32>
    %22 = arith.cmpi eq, %4, %21 : vector<2x128xi32>
    %c0_14 = arith.constant 0 : index
    %c3 = arith.constant 3 : index
    %c0_15 = arith.constant 0 : index
    %c0_16 = arith.constant 0 : index
    %23 = vector.load %arg3[%c0_14, %c3, %c0_15, %c0_16] : memref<1x4x2x128xf32, #tpu.memory_space<vmem>>, vector<1x1x2x128xf32>
    %24 = vector.shape_cast %23 : vector<1x1x2x128xf32> to vector<2x128xf32>
    %25 = arith.select %22, %24, %20 : vector<2x128xi1>, vector<2x128xf32>
    %c255_i32 = arith.constant 255 : i32
    %26 = vector.broadcast %c255_i32 : i32 to vector<2x128xi32>
    %27 = arith.cmpi ne, %4, %26 : vector<2x128xi32>
    %c0_i32_17 = arith.constant 0 : i32
    %28 = vector.broadcast %c0_i32_17 : i32 to vector<2x128xi32>
    %29 = arith.cmpi sge, %4, %28 : vector<2x128xi32>
    %c4_i32 = arith.constant 4 : i32
    %30 = vector.broadcast %c4_i32 : i32 to vector<2x128xi32>
    %31 = arith.cmpi slt, %4, %30 : vector<2x128xi32>
    %32 = arith.andi %29, %31 : vector<2x128xi1>
    %33 = arith.andi %27, %32 : vector<2x128xi1>
    %cst_18 = arith.constant 1.000000e+00 : f32
    %34 = vector.broadcast %cst_18 : f32 to vector<2x128xf32>
    %35 = arith.select %33, %25, %34 : vector<2x128xi1>, vector<2x128xf32>
    %36 = math.log %35 : vector<2x128xf32>
    %cst_19 = arith.constant 0.000000e+00 : f32
    %37 = vector.broadcast %cst_19 : f32 to vector<2x128xf32>
    %38 = arith.subf %37, %36 : vector<2x128xf32>
    %c0_20 = arith.constant 0 : index
    %c0_21 = arith.constant 0 : index
    %c0_22 = arith.constant 0 : index
    %39 = vector.load %arg5[%c0_20, %c0_21, %c0_22] : memref<1x2x128xf32, #tpu.memory_space<vmem>>, vector<1x2x128xf32>
    %40 = vector.shape_cast %39 : vector<1x2x128xf32> to vector<2x128xf32>
    %41 = arith.addf %40, %38 : vector<2x128xf32>
    %c0_23 = arith.constant 0 : index
    %c0_24 = arith.constant 0 : index
    %c0_25 = arith.constant 0 : index
    %42 = vector.load %arg5[%c0_23, %c0_24, %c0_25] : memref<1x2x128xf32, #tpu.memory_space<vmem>>, vector<1x2x128xf32>
    %43 = vector.shape_cast %42 : vector<1x2x128xf32> to vector<2x128xf32>
    %44 = vector.shape_cast %41 : vector<2x128xf32> to vector<1x2x128xf32>
    tpu.vector_store %arg5[%c0_23, %c0_24, %c0_25], %44 {strides = array<i32>} : memref<1x2x128xf32, #tpu.memory_space<vmem>>, vector<1x2x128xf32>,
    %c0_26 = arith.constant 0 : index
    %c0_27 = arith.constant 0 : index
    %c0_28 = arith.constant 0 : index
    %45 = vector.load %arg6[%c0_26, %c0_27, %c0_28] : memref<1x2x128xf32, #tpu.memory_space<vmem>>, vector<1x2x128xf32>
    %46 = vector.shape_cast %45 : vector<1x2x128xf32> to vector<2x128xf32>
    %cst_29 = arith.constant 0.000000e+00 : f32
    %47 = vector.broadcast %cst_29 : f32 to vector<2x128xf32>
    %48 = arith.cmpf one, %38, %47 : vector<2x128xf32>
    %49 = arith.extui %48 : vector<2x128xi1> to vector<2x128xi32>
    %50 = arith.sitofp %49 : vector<2x128xi32> to vector<2x128xf32>
    %51 = arith.addf %46, %50 : vector<2x128xf32>
    %c0_30 = arith.constant 0 : index
    %c0_31 = arith.constant 0 : index
    %c0_32 = arith.constant 0 : index
    %52 = vector.load %arg6[%c0_30, %c0_31, %c0_32] : memref<1x2x128xf32, #tpu.memory_space<vmem>>, vector<1x2x128xf32>
    %53 = vector.shape_cast %52 : vector<1x2x128xf32> to vector<2x128xf32>
    %54 = vector.shape_cast %51 : vector<2x128xf32> to vector<1x2x128xf32>
    tpu.vector_store %arg6[%c0_30, %c0_31, %c0_32], %54 {strides = array<i32>} : memref<1x2x128xf32, #tpu.memory_space<vmem>>, vector<1x2x128xf32>,
    return
  }
  func.func @transform_0(%arg0: i32, %arg1: i32, %arg2: i32) -> (i32, i32, i32, i32) {
    %c1_i32 = arith.constant 1 : i32
    %0 = arith.muli %arg1, %c1_i32 : i32
    %1 = arith.addi %0, %arg2 : i32
    %c0_i32 = arith.constant 0 : i32
    %c0_i32_0 = arith.constant 0 : i32
    %c0_i32_1 = arith.constant 0 : i32
    return %arg0, %c0_i32, %1, %c0_i32_0 : i32, i32, i32, i32
  }
  func.func @transform_1(%arg0: i32, %arg1: i32, %arg2: i32) -> (i32, i32, i32) {
    %c1_i32 = arith.constant 1 : i32
    %0 = arith.muli %arg1, %c1_i32 : i32
    %1 = arith.addi %0, %arg2 : i32
    %c0_i32 = arith.constant 0 : i32
    %c0_i32_0 = arith.constant 0 : i32
    return %arg0, %1, %c0_i32 : i32, i32, i32
  }
  func.func @transform_2(%arg0: i32, %arg1: i32, %arg2: i32) -> (i32, i32, i32) {
    %c1_i32 = arith.constant 1 : i32
    %0 = arith.muli %arg0, %c1_i32 : i32
    %1 = arith.addi %0, %arg1 : i32
    %c0_i32 = arith.constant 0 : i32
    %c0_i32_0 = arith.constant 0 : i32
    %c0_i32_1 = arith.constant 0 : i32
    return %1, %c0_i32, %c0_i32_0 : i32, i32, i32
  }
  func.func @transform_3(%arg0: i32, %arg1: i32, %arg2: i32) -> (i32, i32, i32) {
    %c1_i32 = arith.constant 1 : i32
    %0 = arith.muli %arg0, %c1_i32 : i32
    %1 = arith.addi %0, %arg1 : i32
    %c0_i32 = arith.constant 0 : i32
    %c0_i32_0 = arith.constant 0 : i32
    %c0_i32_1 = arith.constant 0 : i32
    return %1, %c0_i32, %c0_i32_0 : i32, i32, i32
  }
}

</mosaic_0001>

<bundles_post_ra>
// kernel: tpu_custom_call.1
= control target key start
LH: loop header
LB: loop body
LE: loop exit
PB: predicated region body
PF: predicated region fallthrough
CT: control target
= control target key end

     0   :  { %9 = vsyncpa [#allocation3], 0  ;;  %s977_s0 = inlined_call_operand.hbm [shape: f32[2,4,2,128], index: 0, kind: input, shape index: {}]   ;;  %s978_s1 = inlined_call_operand.hbm [shape: s32[2,2,128], index: 1, kind: input, shape index: {}]   ;;  %s979_s2 = inlined_call_operand.hbm [shape: f32[2,2,128], index: 2, kind: output, shape index: {0}]   ;;  %s980_s3 = inlined_call_operand.hbm [shape: f32[2,2,128], index: 3, kind: output, shape index: {1}]  }
   0x1   :  { %11 = vsyncpa [#allocation3 + $0x1], 0 }
   0x2   :  { %12 = vsyncpa [#allocation6], 0 }
   0x3   :  { %14 = vsyncpa [#allocation6 + $0x1], 0 }
   0x4   :  { %15 = vsyncpa [#allocation4], 0 }
   0x5   :  { %17 = vsyncpa [#allocation4 + $0x1], 0 }
   0x6   :  { %18 = vsyncpa [#allocation9], 0 }
   0x7   :  { %20 = vsyncpa [#allocation9 + $0x1], 0  ;;  %s806_s12 = smov 0   ;;  %s808_s13 = smov 0  }
   0x8   :  { %s810_s14 = smov 0   ;;  %s812_s15 = smov 0  }
   0x9   :  { %s814_s16 = smov 0   ;;  %s816_s17 = smov 0  }
   0xa LB: > { %s501_s18 = sadd.s32 4294967295, %s781_s17   ;;  %s502_s19 = sadd.s32 4294967294, %s781_s17   ;;  %s781_s17 = sphi %s816_s17, %s26_s17   ;;  %s777_s16 = sphi %s814_s16, %s990_s16   ;;  %s773_s15 = sphi %s812_s15, %s989_s15   ;;  %s769_s14 = sphi %s810_s14, %s988_s14   ;;  %s765_s13 = sphi %s808_s13, %s987_s13   ;;  %s761_s12 = sphi %s806_s12, %s986_s12  }
   0xb   : > { %s45_s20 = sadd.s32 1, %s777_s16  ;;  %s56_s21 = sadd.s32 1, %s769_s14 }
   0xc   : > { %p47_p0 = scmp.ge.s32.totalorder %s45_s20, 2  ;;  %p63_p1 = scmp.ne.s32.totalorder %s769_s14, %s765_s13 }
   0xd   : > { %p64_p2 = scmp.eq.s32.totalorder %s781_s17, 0  ;;  %p69_p3 = scmp.ne.s32.totalorder %s765_s13, %s761_s12 }
   0xe   : > { %s992_s20 = smov (%p47_p0, %s45_s20), 0  ;;  %p70_p5 = scmp.eq.s32.totalorder %s501_s18, 0 }
   0xf   : > { %p847_p4 = por %p64_p2, %p63_p1  ;;  %s51_s23 = ssub.s32 %s777_s16, %s992_s20 }
  0x10   : > { %p125_p6 = scmp.eq.s32.totalorder %s501_s18, 1  ;;  %p54_p7 = scmp.eq.s32.totalorder %s51_s23, 0 }
  0x11   : > { %p853_p8 = por %p70_p5, %p69_p3  ;;  %p131_p10 = scmp.eq.s32.totalorder %s502_s19, 1 }
  0x12   : > { %p857_p9 = por %p125_p6, %p63_p1  ;;  %p504_p12 = scmp.ge.s32.totalorder %s781_s17, 2 }
  0x13   : > { %s862_s26 = scalar_select %p54_p7, %s769_s14, %s56_s21  }
  0x14   : > { %p864_p11 = por %p131_p10, %p69_p3  ;;  %p548_p13 = scmp.lt.s32.totalorder %s781_s17, 2 }
  0x15   : > { %s179_s28 = sand.u32 1, %s769_s14   ;;  %s525_s30 = sshll.u32 %s777_s16, 3 }
  0x16   : > { %s505_s29 = sshll.u32 %s179_s28, 3  ;;  %s190_s6 = scalar_lea.hbm %s977_s0, %s525_s30 }
  0x17   : > { %s183_s7 = scalar_lea.vmem [#allocation2], %s505_s29  ;;  %s191_s9 = sshll.u32 %s190_s6, 4  ;;  %s192_s9 = int_to_ptr.hbm [resolvable:$true] %s191_s9 }
  0x18   : > { %s193_s8 = sshll.u32 %s183_s7, 4  ;;  %p877_p0 = pnand %p548_p13, %p847_p4  ;;  %s194_s8 = int_to_ptr.vmem [resolvable:$true] %s193_s8 }
  0x19   : > { %p510_p1 = scmp.ge.s32.totalorder %s781_s17, 1  ;;  %s180_s11 = scalar_lea.sflag [#allocation3], %s179_s28 }
  0x1a   : > { %s783_s18 = smov 32   ;;  %s784_s19 = smov 2  }
  0x1b   : > { %537 = dma.hbm_to_vmem [thread:$0]  (!%p877_p0), %s192_s9, 128, %s194_s8, %s180_s11, %s783_s18, %s783_s18, %s784_s19  }
  0x1c   : > { %p222_p2 = scmp.lt.s32.totalorder %s781_s17, 3  ;;  %s508_s21 = sshll.u32 %s179_s28, 1 }
  0x1d   : > { %s509_s23 = sshll.u32 %s777_s16, 1  ;;  %s207_s4 = scalar_lea.vmem [#allocation5], %s508_s21 }
  0x1e   : > { %p223_p3 = pnand %p510_p1, %p222_p2  ;;  %s213_s22 = scalar_lea.hbm %s978_s1, %s509_s23 }
  0x1f   : > { %s217_s5 = sshll.u32 %s207_s4, 4  ;;  %s215_s6 = sshll.u32 %s213_s22, 4  ;;  %s218_s5 = int_to_ptr.vmem [resolvable:$true] %s217_s5  ;;  %s216_s6 = int_to_ptr.hbm [resolvable:$true] %s215_s6 }
  0x20   : > { %s204_s7 = scalar_lea.sflag [#allocation6], %s179_s28  ;;  %226 = sbr.rel (%p223_p3) target bundleno = 77 (0x4d), region = 28 }
  0x21   : > { %540 = dma.hbm_to_vmem [thread:$0]  (!%p877_p0), %s216_s6, 32, %s218_s5, %s204_s7  }
  0x22   : > { %s892_s8 = sand.u32 (!%p223_p3), 1, %s765_s13  }
  0x23   : > { %s511_s9 = sshll.u32 (!%p223_p3), %s892_s8, 3  ;;  %s229_s11 = scalar_lea.sflag (!%p223_p3), [#allocation3], %s892_s8 }
  0x24   : > { %s232_s18 = scalar_lea.vmem (!%p223_p3), [#allocation2], %s511_s9 }
  0x25   : > { %744 = dma.done.wait (%p853_p8), %s229_s11, 128  }
  0x26   : > { %746 = vsyncadd (%p853_p8), %s229_s11, 4294967168  ;;  %s512_s28 = sshll.u32 %s892_s8, 1  ;;  %s239_s10 = scalar_lea.sflag [#allocation6], %s892_s8 }
  0x27   : > { %s242_s19 = scalar_lea.vmem [#allocation5], %s512_s28 }
  0x28   : > { %748 = dma.done.wait (%p853_p8), %s239_s10, 32  }
  0x29   : > { %750 = vsyncadd (%p853_p8), %s239_s10, 4294967264  ;;  %s906_s21 = scalar_lea.vmem [#allocation7], %s512_s28  ;;  %v785_v0 = vmov 0.0   ;;  %s909_s23 = scalar_lea.vmem [#allocation8], %s512_s28  ;;  %v286_v1 = vld [vmem:[%s242_s19] sm:$0x3] }
  0x2a   : > { %284 = vst [vmem:[%s906_s21] sm:$0x3] %v785_v0  ;;  %v288_v2 = vld [vmem:[%s232_s18] sm:$0x3]  ;;  %v515_v3 = vld [vmem:[%s232_s18 + $0x2] sm:$0x3]  ;;  %vm287_vm0 = vcmp.eq.s32.totalorder %v286_v1, 0 }
  0x2b   : > { %285 = vst [vmem:[%s909_s23] sm:$0x3] %v785_v0  ;;  %vm290_vm1 = vcmp.eq.s32.totalorder %v286_v1, 1  ;;  %vm294_vm2 = vcmp.eq.s32.totalorder %v286_v1, 2  ;;  %v516_v4 = vld [vmem:[%s232_s18 + $0x4] sm:$0x3]  ;;  %vm298_vm3 = vcmp.eq.s32.totalorder %v286_v1, 3 }
  0x2c   : > { %v289_v5 = vsel %vm287_vm0, %v288_v2, 0.0  ;;  %v517_v6 = vld [vmem:[%s232_s18 + $0x6] sm:$0x3]  ;;  %vm302_vm4 = vcmp.ne.s32.totalorder %v286_v1, 255  ;;  %vm303_vm5 = vcmp.ge.s32.totalorder %v286_v1, 0  ;;  %vm304_vm6 = vcmp.lt.s32.totalorder %v286_v1, 4 }
  0x2d   : > { %v293_v7 = vsel %vm290_vm1, %v515_v3, %v289_v5  ;;  %vm305_vm7 = vmand %vm303_vm5, %vm304_vm6  ;;  %s521_s24 = sshll.u32 %s773_s15, 1  ;;  %s339_s7 = sshll.u32 %s906_s21, 4  ;;  %s340_s7 = int_to_ptr.vmem [resolvable:$true] %s339_s7 }
  0x2e   : > { %v297_v8 = vsel %vm294_vm2, %v516_v4, %v293_v7  ;;  %vm306_vm8 = vmand %vm302_vm4, %vm305_vm7  ;;  %s337_s22 = scalar_lea.hbm %s979_s2, %s521_s24  ;;  %s352_s6 = scalar_lea.hbm %s980_s3, %s521_s24 }
  0x2f   : > { %v301_v9 = vsel %vm298_vm3, %v517_v6, %v297_v8  ;;  %s341_s9 = sshll.u32 %s337_s22, 4  ;;  %s354_s11 = sshll.u32 %s909_s23, 4  ;;  %s342_s9 = int_to_ptr.hbm [resolvable:$true] %s341_s9  ;;  %s924_s11 = int_to_ptr.vmem [resolvable:$true] %s354_s11 }
  0x30   : > { %v307_v10 = vsel %vm306_vm8, %v301_v9, 1.0  ;;  %s356_s15 = sshll.u32 %s352_s6, 4  ;;  %s321_s18 = scalar_lea.sflag [#allocation4], %s892_s8  ;;  %s926_s15 = int_to_ptr.hbm [resolvable:$true] %s356_s15 }
  0x31   : > { %601 = vlog2.f32 %v307_v10  ;;  %v311_v13 = vld [vmem:[%s906_s21] sm:$0x3]  ;;  %s677_s28 = sshra.s32 %s342_s9, 4  ;;  %s683_s29 = scalar_lea.hbm %s979_s2, 4  ;;  %s678_s28 = int_to_ptr.hbm [resolvable:$true] %s677_s28 }
  0x32   : > { %v314_v15 = vld [vmem:[%s909_s23] sm:$0x3]  ;;  %s679_s10 = scalar_lea.hbm %s678_s28, 2  ;;  %p684_p7 = scmp.lt.s32.totalorder %s678_s28, %s979_s2 }
  0x33   : > { %p680_p4 = scmp.ne.s32.totalorder %s678_s28, %s679_s10  ;;  %p685_p8 = scmp.lt.s32.totalorder %s683_s29, %s679_s10 }
  0x35   : > { %p681_p5 = pnand %p680_p4, %p857_p9  ;;  %p686_p10 = por %p685_p8, %p684_p7 }
  0x37   : > { %v602_v11 = vpop.eup %601  ;;  %p682_p6 = pneg %p681_p5 }
  0x38   : > { %v309_v12 = vmul.f32 0.6931472, %v602_v11 }
  0x39   : > { %p687_p13 = pnand %p686_p10, %p682_p6 }
  0x3a   : > { %v310_v14 = vsub.f32 0.0, %v309_v12 }
  0x3c   : > { %vm315_vm9 = vcmp.ne.f32.partialorder %v310_v14, 0.0  ;;  %v312_v16 = vadd.f32 %v311_v13, %v310_v14 }
  0x3d   : > { %v518_v17 = vsel %vm315_vm9, 1.0, %v785_v0 }
  0x3e   : > { %313 = vst [vmem:[%s906_s21] sm:$0x3] %v312_v16  ;;  %v318_v18 = vadd.f32 %v518_v17, %v314_v15 }
  0x3f   : > { %690 = shalt.err (!%p687_p13)
}
  0x40   : > { %530 = dma.vmem_to_hbm [thread:$0]  (%p857_p9), %s340_s7, 32, %s342_s9, %s321_s18   ;;  %319 = vst [vmem:[%s909_s23] sm:$0x3] %v318_v18 }
  0x41   : > { %s326_s21 = scalar_lea.sflag [#allocation9], %s892_s8  ;;  %s705_s4 = sshra.s32 %s926_s15, 4  ;;  %s706_s4 = int_to_ptr.hbm [resolvable:$true] %s705_s4 }
  0x42   : > { %s707_s5 = scalar_lea.hbm %s706_s4, 2  ;;  %s711_s10 = scalar_lea.hbm %s980_s3, 4 }
  0x43   : > { %p708_p0 = scmp.ne.s32.totalorder %s706_s4, %s707_s5  ;;  %p712_p3 = scmp.lt.s32.totalorder %s706_s4, %s980_s3 }
  0x44   : > { %p713_p4 = scmp.lt.s32.totalorder %s711_s10, %s707_s5 }
  0x45   : > { %p709_p1 = pnand %p708_p0, %p857_p9 }
  0x46   : > { %p714_p5 = por %p713_p4, %p712_p3 }
  0x47   : > { %p710_p2 = pneg %p709_p1 }
  0x49   : > { %p715_p6 = pnand %p714_p5, %p710_p2 }
  0x4b   : > { %718 = shalt.err (!%p715_p6)
}
  0x4c   : > { %531 = dma.vmem_to_hbm [thread:$0]  (%p857_p9), %s924_s11, 32, %s926_s15, %s326_s21  }
  0x4d PF: > { %s368_s8 = sand.u32 1, %s761_s12   ;;  %p542_p7 = pnand %p504_p12, %p864_p11 }
  0x4e   : > { %s369_s23 = scalar_lea.sflag [#allocation4], %s368_s8 }
  0x4f   : > { %p543_p8 = pneg %p542_p7 }
  0x51   : > { %752 = dma.done.wait (%p543_p8), %s369_s23, 32  }
  0x52   : > { %754 = vsyncadd (%p543_p8), %s369_s23, 4294967264  ;;  %s379_s7 = scalar_lea.sflag [#allocation9], %s368_s8 }
  0x53   : > { %756 = dma.done.wait (%p543_p8), %s379_s7, 32  }
  0x54   : > { %758 = vsyncadd (%p543_p8), %s379_s7, 4294967264  ;;  %s26_s17 = sadd.s32 1, %s781_s17   ;;  %s986_s12 = smov %s765_s13 }
  0x55   : > { %p23_p10 = scmp.ge.s32.totalorder %s26_s17, 4   ;;  %s987_s13 = smov %s769_s14 }
  0x56   : > { %s988_s14 = smov %s862_s26  ;;  %s989_s15 = smov %s777_s16 }
  0x57   : > { %s990_s16 = smov %s992_s20  ;;  %25 = sbr.rel (!%p23_p10) target bundleno = 10 (0xa), region = 110 }
  0x5c   :  { %385 = vsyncpa [#allocation3], 1 }
  0x5d   :  { %387 = vsyncpa [#allocation3 + $0x1], 1 }
  0x5e   :  { %388 = vsyncpa [#allocation6], 1 }
  0x5f   :  { %390 = vsyncpa [#allocation6 + $0x1], 1 }
  0x60   :  { %391 = vsyncpa [#allocation4], 1 }
  0x61   :  { %393 = vsyncpa [#allocation4 + $0x1], 1 }
  0x62   :  { %394 = vsyncpa [#allocation9], 1 }
  0x63   :  { %396 = vsyncpa [#allocation9 + $0x1], 1 }

</bundles_post_ra>
